<compile_context>
chip_gen: v7x
topology: tpu7x:2x2x1
jax: 0.10.0
libtpu: 0.0.40
codegen_flags: <defaults>
</compile_context>

<pallas_src>
import jax
import jax.numpy as jnp
from jax.experimental import pallas as pl
from jax.experimental.pallas import tpu as pltpu


def polymlp_kernel(x_ref, w1_ref, b1_ref, w2_ref, b2_ref, o_ref):
    # In-kernel f32 -> bf16 cast of the activations (VPU has plenty of slack).
    x = x_ref[...].astype(jnp.bfloat16)                               # (tb, D_in)
    # fc1 on the MXU, f32 accumulation; bias + ReLU in f32.
    h = jnp.dot(x, w1_ref[...], preferred_element_type=jnp.float32)   # (tb, H)
    h = jnp.maximum(h + b1_ref[...], 0.0)
    # fc2: cast hidden to bf16 for the MXU, accumulate in f32.
    y = jnp.dot(h.astype(jnp.bfloat16), w2_ref[...],
                preferred_element_type=jnp.float32)                   # (tb, D_out)
    o_ref[...] = (y + b2_ref[...]).astype(o_ref.dtype)


def _round_up(n, m):
    return ((n + m - 1) // m) * m


def prepare_polymlp_params(w1, b1, w2, b2):
    """One-time parameter prep (hoisted out of the per-call forward).

    w1: [D_in, H], b1: [H], w2: [H, D_out], b2: [D_out]  (weights pre-transposed
    relative to nn.Linear's [out, in] storage).
    """
    return {
        "w1": w1.astype(jnp.bfloat16),
        "b1": b1.astype(jnp.float32).reshape(1, -1),
        "w2": w2.astype(jnp.bfloat16),
        "b2": b2.astype(jnp.float32).reshape(1, -1),
    }


def _choose_tile(B, row_tile):
    """Balanced batch tiling: minimal padding, >=2 grid steps for big batches."""
    n_tiles = pl.cdiv(B, row_tile)
    # v7x has 2 TensorCores per chip; give a large single-tile batch at least
    # two parallel grid steps so both cores get work (each still >= 512 rows).
    if n_tiles == 1 and B >= 1024:
        n_tiles = 2
    tile_b = max(8, _round_up(pl.cdiv(B, n_tiles), 8))
    n_tiles = pl.cdiv(B, tile_b)
    return tile_b, n_tiles


def _vmem_estimate_bytes(tile_b, d_in, H, d_out):
    x_bytes = 2 * tile_b * d_in * 4            # double-buffered f32 input tile
    out_bytes = 2 * tile_b * d_out * 4         # double-buffered f32 output tile
    w_bytes = 2 * ((d_in * H + H * d_out) * 2 + (H + d_out) * 4)
    tmp_bytes = tile_b * (H * 4 + H * 2 + d_out * 4)   # hidden f32 + bf16 + y f32
    return x_bytes + out_bytes + w_bytes + tmp_bytes


def polymlp_forward(x, params, *, row_tile=2048):
    """x: [B, D_in] f32; params: output of prepare_polymlp_params."""
    w1, b1, w2, b2 = params["w1"], params["b1"], params["w2"], params["b2"]
    B, d_in = x.shape
    H = w1.shape[1]
    d_out = w2.shape[1]

    tile_b, n_tiles = _choose_tile(B, row_tile)
    B_pad = tile_b * n_tiles

    x_p = x if B_pad == B else jnp.pad(x, ((0, B_pad - B), (0, 0)))

    cp_kwargs = dict(dimension_semantics=("parallel",))
    est = _vmem_estimate_bytes(tile_b, d_in, H, d_out)
    if est > 14 * 1024 * 1024:   # only needed if tiles are pushed past ~8K rows (v5e 16 MiB default)
        cp_kwargs["vmem_limit_bytes"] = min(2 * est, 96 * 1024 * 1024)

    out = pl.pallas_call(
        polymlp_kernel,
        out_shape=jax.ShapeDtypeStruct((B_pad, d_out), x.dtype),
        grid=(n_tiles,),
        in_specs=[
            pl.BlockSpec((tile_b, d_in), lambda i: (i, 0)),   # x tile moves with grid
            pl.BlockSpec((d_in, H), lambda i: (0, 0)),        # weights/biases pinned
            pl.BlockSpec((1, H), lambda i: (0, 0)),
            pl.BlockSpec((H, d_out), lambda i: (0, 0)),
            pl.BlockSpec((1, d_out), lambda i: (0, 0)),
        ],
        out_specs=pl.BlockSpec((tile_b, d_out), lambda i: (i, 0)),
        compiler_params=pltpu.CompilerParams(**cp_kwargs),
    )(x_p, w1, b1, w2, b2)

    # Padded rows hold ReLU(b1) @ w2 + b2 garbage; drop them (only when padded).
    return out if B_pad == B else out[:B]


def reference_forward_bf16(x, w1, b1, w2, b2):
    """Mirrors the kernel's bf16-input / f32-accumulate path."""
    h = jnp.dot(x.astype(jnp.bfloat16), w1.astype(jnp.bfloat16),
                preferred_element_type=jnp.float32)
    h = jnp.maximum(h + b1.astype(jnp.float32), 0.0)
    y = jnp.dot(h.astype(jnp.bfloat16), w2.astype(jnp.bfloat16),
                preferred_element_type=jnp.float32)
    return y + b2.astype(jnp.float32)


def reference_forward_f32(x, w1, b1, w2, b2):
    h = jnp.maximum(x @ w1 + b1, 0.0)
    return h @ w2 + b2


if __name__ == "__main__":
    # Dimensions implied by the module: input_dim free, hidden_dim=128, output_dim=88.
    B, input_dim, hidden_dim, output_dim = 8, 32, 128, 88

    key = jax.random.PRNGKey(0)
    kx, k1, k2, k3, k4 = jax.random.split(key, 5)

    x = jax.random.normal(kx, (B, input_dim), dtype=jnp.float32)
    # Deterministic "Linear-like" init (uniform in +/- 1/sqrt(fan_in)),
    # weights stored pre-transposed as [in, out].
    lim1 = 1.0 / jnp.sqrt(jnp.float32(input_dim))
    lim2 = 1.0 / jnp.sqrt(jnp.float32(hidden_dim))
    w1 = jax.random.uniform(k1, (input_dim, hidden_dim), jnp.float32, -lim1, lim1)
    b1 = jax.random.uniform(k2, (hidden_dim,), jnp.float32, -lim1, lim1)
    w2 = jax.random.uniform(k3, (hidden_dim, output_dim), jnp.float32, -lim2, lim2)
    b2 = jax.random.uniform(k4, (output_dim,), jnp.float32, -lim2, lim2)

    # One-time parameter preparation (hoisted out of the per-call forward).
    params = prepare_polymlp_params(w1, b1, w2, b2)

    out = polymlp_forward(x, params)
    out = jax.block_until_ready(out)

    assert out.shape == (B, output_dim)

    # Tight check vs a reference using the same bf16-matmul / f32-accumulate path.
    ref_bf16 = reference_forward_bf16(x, w1, b1, w2, b2)
    assert jnp.allclose(out, ref_bf16, atol=1e-3, rtol=1e-3)

    # Sanity check vs the pure-f32 reference (bf16 quantization error bound).
    ref_f32 = reference_forward_f32(x, w1, b1, w2, b2)
    assert jnp.allclose(out, ref_f32, atol=3e-2, rtol=3e-2)

    print("KERNEL_OK")
</pallas_src>

<mosaic_0001>
module attributes {stable_mosaic.version = 11 : i64} {
  func.func @polymlp_kernel(%arg0: i32, %arg1: memref<8x32xf32, #tpu.memory_space<vmem>>, %arg2: memref<32x128xbf16, #tpu.memory_space<vmem>>, %arg3: memref<1x128xf32, #tpu.memory_space<vmem>>, %arg4: memref<128x88xbf16, #tpu.memory_space<vmem>>, %arg5: memref<1x88xf32, #tpu.memory_space<vmem>>, %arg6: memref<8x88xf32, #tpu.memory_space<vmem>>) attributes {dimension_semantics = [#tpu.dimension_semantics<parallel>], iteration_bounds = array<i64: 1>, scalar_prefetch = 0 : i64, scratch_operands = 0 : i64, tpu.core_type = #tpu.core_type<tc>, window_params = [{transform_indices = @transform_0, window_bounds = array<i64: 8, 32>}, {pipeline_mode = #tpu.pipeline_mode<synchronous>, transform_indices = @transform_1, window_bounds = array<i64: 32, 128>}, {pipeline_mode = #tpu.pipeline_mode<synchronous>, transform_indices = @transform_2, window_bounds = array<i64: 1, 128>}, {pipeline_mode = #tpu.pipeline_mode<synchronous>, transform_indices = @transform_3, window_bounds = array<i64: 128, 88>}, {pipeline_mode = #tpu.pipeline_mode<synchronous>, transform_indices = @transform_4, window_bounds = array<i64: 1, 88>}, {transform_indices = @transform_5, window_bounds = array<i64: 8, 88>}]} {
    %c0 = arith.constant 0 : index
    %c0_0 = arith.constant 0 : index
    %0 = vector.load %arg1[%c0, %c0_0] : memref<8x32xf32, #tpu.memory_space<vmem>>, vector<8x32xf32>
    %1 = arith.truncf %0 : vector<8x32xf32> to vector<8x32xbf16>
    %c0_1 = arith.constant 0 : index
    %c0_2 = arith.constant 0 : index
    %2 = vector.load %arg2[%c0_1, %c0_2] : memref<32x128xbf16, #tpu.memory_space<vmem>>, vector<32x128xbf16>
    %cst = arith.constant dense<0.000000e+00> : vector<8x128xf32>
    %3 = tpu.matmul %1, %2, %cst {dimension_numbers = #tpu.dot_dimension_numbers<[1], [0], [0], [1], [0, 0, 1, 1], [], []>} : vector<8x32xbf16>, vector<32x128xbf16>, vector<8x128xf32> -> vector<8x128xf32>
    %c0_3 = arith.constant 0 : index
    %c0_4 = arith.constant 0 : index
    %4 = vector.load %arg3[%c0_3, %c0_4] : memref<1x128xf32, #tpu.memory_space<vmem>>, vector<1x128xf32>
    %5 = vector.broadcast %4 : vector<1x128xf32> to vector<8x128xf32>
    %6 = arith.addf %3, %5 : vector<8x128xf32>
    %cst_5 = arith.constant 0.000000e+00 : f32
    %7 = vector.broadcast %cst_5 : f32 to vector<8x128xf32>
    %8 = arith.maximumf %6, %7 : vector<8x128xf32>
    %9 = arith.truncf %8 : vector<8x128xf32> to vector<8x128xbf16>
    %c0_6 = arith.constant 0 : index
    %c0_7 = arith.constant 0 : index
    %10 = vector.load %arg4[%c0_6, %c0_7] : memref<128x88xbf16, #tpu.memory_space<vmem>>, vector<128x88xbf16>
    %cst_8 = arith.constant dense<0.000000e+00> : vector<8x88xf32>
    %11 = tpu.matmul %9, %10, %cst_8 {dimension_numbers = #tpu.dot_dimension_numbers<[1], [0], [0], [1], [0, 0, 1, 1], [], []>} : vector<8x128xbf16>, vector<128x88xbf16>, vector<8x88xf32> -> vector<8x88xf32>
    %c0_9 = arith.constant 0 : index
    %c0_10 = arith.constant 0 : index
    %12 = vector.load %arg5[%c0_9, %c0_10] : memref<1x88xf32, #tpu.memory_space<vmem>>, vector<1x88xf32>
    %13 = vector.broadcast %12 : vector<1x88xf32> to vector<8x88xf32>
    %14 = arith.addf %11, %13 : vector<8x88xf32>
    %c0_11 = arith.constant 0 : index
    %c0_12 = arith.constant 0 : index
    %15 = vector.load %arg6[%c0_11, %c0_12] : memref<8x88xf32, #tpu.memory_space<vmem>>, vector<8x88xf32>
    tpu.vector_store %arg6[%c0_11, %c0_12], %14 {strides = array<i32>} : memref<8x88xf32, #tpu.memory_space<vmem>>, vector<8x88xf32>,
    return
  }
  func.func @transform_0(%arg0: i32) -> (i32, i32) {
    %c0_i32 = arith.constant 0 : i32
    %c0_i32_0 = arith.constant 0 : i32
    return %arg0, %c0_i32 : i32, i32
  }
  func.func @transform_1(%arg0: i32) -> (i32, i32) {
    %c0_i32 = arith.constant 0 : i32
    %c0_i32_0 = arith.constant 0 : i32
    %c0_i32_1 = arith.constant 0 : i32
    return %c0_i32, %c0_i32_0 : i32, i32
  }
  func.func @transform_2(%arg0: i32) -> (i32, i32) {
    %c0_i32 = arith.constant 0 : i32
    %c0_i32_0 = arith.constant 0 : i32
    %c0_i32_1 = arith.constant 0 : i32
    return %c0_i32, %c0_i32_0 : i32, i32
  }
  func.func @transform_3(%arg0: i32) -> (i32, i32) {
    %c0_i32 = arith.constant 0 : i32
    %c0_i32_0 = arith.constant 0 : i32
    %c0_i32_1 = arith.constant 0 : i32
    return %c0_i32, %c0_i32_0 : i32, i32
  }
  func.func @transform_4(%arg0: i32) -> (i32, i32) {
    %c0_i32 = arith.constant 0 : i32
    %c0_i32_0 = arith.constant 0 : i32
    %c0_i32_1 = arith.constant 0 : i32
    return %c0_i32, %c0_i32_0 : i32, i32
  }
  func.func @transform_5(%arg0: i32) -> (i32, i32) {
    %c0_i32 = arith.constant 0 : i32
    %c0_i32_0 = arith.constant 0 : i32
    return %arg0, %c0_i32 : i32, i32
  }
}

</mosaic_0001>

<bundles_post_ra>
// kernel: tpu_custom_call.1
= control target key start
LH: loop header
LB: loop body
LE: loop exit
PB: predicated region body
PF: predicated region fallthrough
CT: control target
= control target key end

     0   :  { %v310_v1 = vmov 0.0   ;;  %vm311_vm0 = vmmov 0   ;;  %vm47_vm1 = vcmask 261120   ;;  %s394_s0 = inlined_call_operand.vmem [shape: f32[8,32], index: 0, kind: input, shape index: {}]   ;;  %s395_s1 = inlined_call_operand.vmem [shape: bf16[32,128], index: 1, kind: input, shape index: {}]   ;;  %s396_s2 = inlined_call_operand.vmem [shape: f32[1,128], index: 2, kind: input, shape index: {}]   ;;  %s397_s3 = inlined_call_operand.vmem [shape: bf16[128,88], index: 3, kind: input, shape index: {}]   ;;  %s398_s4 = inlined_call_operand.vmem [shape: f32[1,88], index: 4, kind: input, shape index: {}]   ;;  %s399_s5 = inlined_call_operand.hbm [shape: f32[8,88], index: 5, kind: output, shape index: {}]  }
   0x1   :  { %v276_v0 = vld [vmem:[%s395_s1] sm:$0xff]   ;;  %245 = vmatprep.subr.bf16.mxu0 %v310_v1  ;;  %v277_v2 = vld [vmem:[%s395_s1 + $0x8] sm:$0xff]   ;;  %253 = vmatprep.subr.bf16.mxu1 %v310_v1  ;;  %v280_v7 = vld [vmem:[%s397_s3 + $0x10] sm:$0xff]  }
   0x2   :  { %246 = vmatpush3.bf16.msra.mxu0 %v276_v0  ;;  %249 = vmatprep.mubr.msk.bf16.mxu0 %vm311_vm0, %v310_v1  ;;  %v22_v3 = vld [vmem:[%s394_s0] sm:$0xff]  ;;  %v279_v6 = vld [vmem:[%s397_s3 + $0x8] sm:$0xff]  }
   0x3   :  { %247 = vmatprep.subr.bf16.mxu0 %v310_v1  ;;  %v278_v4 = vld [vmem:[%s397_s3] sm:$0xff]   ;;  %269 = vmatprep.mubr.msk.bf16.mxu1 %vm311_vm0, %v310_v1  ;;  %v23_v5 = vpack.c.bf16 %v22_v3, %v22_v3 }
   0x4   :  { %254 = vmatpush3.bf16.msra.mxu1 %v278_v4 }
   0x5   :  { %255 = vmatprep.subr.bf16.mxu1 %v310_v1 }
   0x6   :  { %248 = vmatpush3.bf16.msra.mxu0 %v277_v2 }
   0x8   :  { %256 = vmatpush3.bf16.msra.mxu1 %v279_v6 }
   0x9   :  { %250 = vmatmul.mubr.msk.bf16.vlgmr.msra.gmra.mrb[0].mxu0 %vm47_vm1, %v23_v5  ;;  %257 = vmatprep.subr.bf16.mxu1 %v310_v1 }
   0xa   :  { %10 = vsyncpa [#allocation3], 0  ;;  %v281_v8 = vld [vmem:[%s397_s3 + $0x18] sm:$0xff]   ;;  %v282_v9 = vld [vmem:[%s397_s3 + $0x20] sm:$0xff]   ;;  %s312_s17 = smov [#allocation2]   ;;  %vm204_vm2 = vcmask 719872  }
   0xb   :  { %v283_v10 = vld [vmem:[%s397_s3 + $0x28] sm:$0xff]   ;;  %v284_v11 = vld [vmem:[%s397_s3 + $0x30] sm:$0xff]   ;;  %v285_v12 = vld [vmem:[%s397_s3 + $0x38] sm:$0xff]   ;;  %s212_s18 = sshll.u32 %s312_s17, 4  ;;  %s213_s18 = int_to_ptr.vmem [resolvable:$true] %s212_s18 }
   0xc   :  { %258 = vmatpush3.bf16.msra.mxu1 %v280_v7  ;;  %v220_v13 = vld [vmem:[%s396_s2] ss:$0 sm:$0xff]  ;;  %s286_s2 = scalar_lea.vmem %s213_s18, 128  ;;  %p291_p1 = scmp.lt.s32.totalorder %s213_s18, %s213_s18 }
   0xd   :  { %259 = vmatprep.subr.bf16.mxu1 %v310_v1  ;;  %v224_v21 = vld [vmem:[%s398_s4] ss:$0 sm:$0xff]  ;;  %p287_p0 = scmp.ne.s32.totalorder %s213_s18, %s286_s2  ;;  %p292_p2 = scmp.lt.s32.totalorder %s286_s2, %s286_s2 }
   0xf   :  { %p293_p3 = por %p292_p2, %p291_p1 }
  0x10   :  { %260 = vmatpush3.bf16.msra.mxu1 %v281_v8 }
  0x11   :  { %261 = vmatprep.subr.bf16.mxu1 %v310_v1  ;;  %p294_p4 = pnand %p293_p3, %p287_p0 }
  0x14   :  { %262 = vmatpush3.bf16.msra.mxu1 %v282_v9 }
  0x15   :  { %263 = vmatprep.subr.bf16.mxu1 %v310_v1 }
  0x18   :  { %264 = vmatpush3.bf16.msra.mxu1 %v283_v10 }
  0x19   :  { %265 = vmatprep.subr.bf16.mxu1 %v310_v1 }
  0x1c   :  { %266 = vmatpush3.bf16.msra.mxu1 %v284_v11 }
  0x1d   :  { %267 = vmatprep.subr.bf16.mxu1 %v310_v1 }
  0x20   :  { %268 = vmatpush3.bf16.msra.mxu1 %v285_v12 }
  0xdc   :  { %v85_v14 = vpop.f32.mrb[0].mxu0 }
  0xdd   :  { %v86_v15 = vadd.f32 %v220_v13, %v85_v14  ;;  %v251_v16 = vpop.f32.mrb[1].mxu0 }
  0xde   :  { %v88_v17 = vpop.f32.mrb[2].mxu0 }
  0xdf   :  { %v91_v18 = vmax.f32 %v86_v15, 0.0  ;;  %v252_v19 = vpop.f32.mrb[3].mxu0 }
  0xe1   :  { %v92_v20 = vpack.c.bf16 %v91_v18, %v91_v18 }
  0xe3   :  { %270 = vmatmul.mubr.bf16.vlgmr.msra.gmra.mrb[0].mxu1 %v92_v20 }
 0x1b6   :  { %v198_v22 = vpop.f32.mrb[0].mxu1 }
 0x1b7   :  { %v199_v23 = vadd.f32 %v224_v21, %v198_v22  ;;  %v271_v24 = vpop.f32.mrb[1].mxu1 }
 0x1b8   :  { %v201_v25 = vpop.f32.mrb[2].mxu1 }
 0x1b9   :  { %v272_v26 = vpop.f32.mrb[3].mxu1  ;;  %205 = vst.msk [vmem:[#allocation2] sm:$0xff] %vm204_vm2, %v199_v23 }
 0x1ba   :  { %297 = shalt.err (!%p294_p4)
}
 0x1bb   :  { %s298_s4 = scalar_lea.hbm %s399_s5, 128 }
 0x1bc   :  { %p299_p5 = scmp.ne.s32.totalorder %s399_s5, %s298_s4  ;;  %p302_p6 = scmp.lt.u32.totalorder %s298_s4, %s399_s5 }
 0x1be   :  { %p304_p7 = pnand %p302_p6, %p299_p5 }
 0x1c0   :  { %307 = shalt.err (!%p304_p7)
}
 0x1c1   :  { %215 = dma.vmem_to_hbm [thread:$0]  %s213_s18, 128, %s399_s5, [#allocation3]  }
 0x1c2   :  { %308 = dma.done.wait [#allocation3], 128  }
 0x1c3   :  { %309 = vsyncadd [#allocation3], 4294967168 }
 0x1c4   :  { %219 = vsyncpa [#allocation3], 1 }

</bundles_post_ra>
